<compile_context>
chip_gen: v7x
topology: tpu7x:2x2x1
jax: 0.10.0
libtpu: 0.0.40
codegen_flags: <defaults>
</compile_context>

<pallas_src>
import math

import jax
import jax.numpy as jnp
from jax.experimental import pallas as pl
from jax.experimental.pallas import tpu as pltpu

# Model dims (from the PyTorch module: input_size=len(classOrder)=10, N=50).
INPUT_SIZE = 10
OUTPUT_SIZE = 50
LAYER_DIMS = [INPUT_SIZE, 256, 256, 256, 128, 128, 64, 32, OUTPUT_SIZE]
NUM_LAYERS = len(LAYER_DIMS) - 1  # 8 linear layers


def _pad128(d):
    return ((d + 127) // 128) * 128


PAD_DIMS = [_pad128(d) for d in LAYER_DIMS]   # [128,256,256,256,128,128,128,128,128]
W_SLAB_COLS = max(PAD_DIMS[1:])               # 256
W_ROW_OFFSETS = []
_off = 0
for _i in range(NUM_LAYERS):
    W_ROW_OFFSETS.append(_off)
    _off += PAD_DIMS[_i]
W_SLAB_ROWS = _off                            # 1408 (every offset is 128-aligned)


def mlp_kernel(x_ref, w_ref, b_ref, o_ref):
    """x_ref: [TB, 128] f32 | w_ref: [1408, 256] bf16 | b_ref: [8, 256] f32."""
    h = x_ref[...]                                    # f32, lane-dense
    for layer in range(NUM_LAYERS):
        din, dout = PAD_DIMS[layer], PAD_DIMS[layer + 1]
        off = W_ROW_OFFSETS[layer]
        w = w_ref[off:off + din, 0:dout]              # bf16, tile-aligned static slice
        b = b_ref[layer:layer + 1, 0:dout]            # f32 [1, dout]
        acc = jnp.dot(h.astype(jnp.bfloat16), w,
                      preferred_element_type=jnp.float32)   # MXU, f32 acc
        h = acc + b
        if layer < NUM_LAYERS - 1:
            h = jnp.maximum(h, 0.0)                   # ReLU on VPU (f32)
        else:
            h = 1.0 / (1.0 + jnp.exp(-h))             # sigmoid: exp on EUP, f32
    o_ref[...] = h                                    # [TB, 128] lane-dense store


def pack_params(params):
    """Pack per-layer (W [in,out] f32, b [1,out] f32) into bf16 / f32 slabs."""
    w_rows, b_rows = [], []
    for i, (w, b) in enumerate(params):
        din, dout = LAYER_DIMS[i], LAYER_DIMS[i + 1]
        pin = PAD_DIMS[i]
        wp = jnp.zeros((pin, W_SLAB_COLS), jnp.bfloat16)
        wp = wp.at[:din, :dout].set(w.astype(jnp.bfloat16))
        bp = jnp.zeros((1, W_SLAB_COLS), jnp.float32)
        bp = bp.at[:, :dout].set(jnp.reshape(b, (1, dout)).astype(jnp.float32))
        w_rows.append(wp)
        b_rows.append(bp)
    return jnp.concatenate(w_rows, axis=0), jnp.concatenate(b_rows, axis=0)


def seq_rl_model_forward(x, params, *, max_batch_tile=256):
    """x: [B, INPUT_SIZE] float32; params: list of (W [in,out], b [1,out])."""
    B = x.shape[0]
    w_slab, b_slab = pack_params(params)

    # Batch tile: multiple of 8, capped at max_batch_tile; pad B up to a whole
    # number of tiles (padded rows are garbage and sliced off below).
    TB = min(max_batch_tile, max(8, ((B + 7) // 8) * 8))
    B_pad = pl.cdiv(B, TB) * TB
    grid = (B_pad // TB,)

    x_pad = jnp.zeros((B_pad, PAD_DIMS[0]), jnp.float32)
    x_pad = x_pad.at[:B, :INPUT_SIZE].set(x.astype(jnp.float32))

    out = pl.pallas_call(
        mlp_kernel,
        out_shape=jax.ShapeDtypeStruct((B_pad, PAD_DIMS[-1]), jnp.float32),
        grid=grid,
        in_specs=[
            pl.BlockSpec((TB, PAD_DIMS[0]), lambda i: (i, 0)),
            # Constant-index full blocks: weights / biases stay VMEM-resident.
            pl.BlockSpec((W_SLAB_ROWS, W_SLAB_COLS), lambda i: (0, 0)),
            pl.BlockSpec((NUM_LAYERS, W_SLAB_COLS), lambda i: (0, 0)),
        ],
        out_specs=pl.BlockSpec((TB, PAD_DIMS[-1]), lambda i: (i, 0)),
        compiler_params=pltpu.CompilerParams(
            dimension_semantics=("parallel",)),
    )(x_pad, w_slab, b_slab)

    return out[:B, :OUTPUT_SIZE]


def init_params(key):
    """Deterministic init mimicking nn.Linear default: U(-1/sqrt(fan_in), +...)."""
    params = []
    for i in range(NUM_LAYERS):
        fan_in, fan_out = LAYER_DIMS[i], LAYER_DIMS[i + 1]
        key, kw, kb = jax.random.split(key, 3)
        bound = 1.0 / math.sqrt(fan_in)
        w = jax.random.uniform(kw, (fan_in, fan_out), jnp.float32, -bound, bound)
        b = jax.random.uniform(kb, (1, fan_out), jnp.float32, -bound, bound)
        params.append((w, b))
    return params


def reference_forward(x, params):
    """Same math as the kernel (bf16 weights/activations at the dot, f32 acc)."""
    h = x.astype(jnp.float32)
    for i, (w, b) in enumerate(params):
        wb = w.astype(jnp.bfloat16)
        h = jnp.dot(h.astype(jnp.bfloat16), wb,
                    preferred_element_type=jnp.float32) + b
        if i < NUM_LAYERS - 1:
            h = jnp.maximum(h, 0.0)
        else:
            h = jax.nn.sigmoid(h)
    return h


if __name__ == "__main__":
    key = jax.random.PRNGKey(0)
    key, kx = jax.random.split(key)

    B = 8
    x = jax.random.normal(kx, (B, INPUT_SIZE), jnp.float32)
    params = init_params(key)

    out = seq_rl_model_forward(x, params)
    out = jax.block_until_ready(out)

    ref = reference_forward(x, params)
    assert out.shape == (B, OUTPUT_SIZE), out.shape
    max_err = float(jnp.max(jnp.abs(out - ref)))
    assert jnp.allclose(out, ref, atol=2e-3, rtol=2e-3), f"mismatch: {max_err}"

    print("KERNEL_OK")
</pallas_src>

<mosaic_0001>
module attributes {stable_mosaic.version = 11 : i64} {
  func.func @mlp_kernel(%arg0: i32, %arg1: memref<8x128xf32, #tpu.memory_space<vmem>>, %arg2: memref<1408x256xbf16, #tpu.memory_space<vmem>>, %arg3: memref<8x256xf32, #tpu.memory_space<vmem>>, %arg4: memref<8x128xf32, #tpu.memory_space<vmem>>) attributes {dimension_semantics = [#tpu.dimension_semantics<parallel>], iteration_bounds = array<i64: 1>, scalar_prefetch = 0 : i64, scratch_operands = 0 : i64, tpu.core_type = #tpu.core_type<tc>, window_params = [{transform_indices = @transform_0, window_bounds = array<i64: 8, 128>}, {pipeline_mode = #tpu.pipeline_mode<synchronous>, transform_indices = @transform_1, window_bounds = array<i64: 1408, 256>}, {pipeline_mode = #tpu.pipeline_mode<synchronous>, transform_indices = @transform_2, window_bounds = array<i64: 8, 256>}, {transform_indices = @transform_3, window_bounds = array<i64: 8, 128>}]} {
    %c0 = arith.constant 0 : index
    %c0_0 = arith.constant 0 : index
    %0 = vector.load %arg1[%c0, %c0_0] : memref<8x128xf32, #tpu.memory_space<vmem>>, vector<8x128xf32>
    %c0_1 = arith.constant 0 : index
    %c0_2 = arith.constant 0 : index
    %1 = vector.load %arg2[%c0_1, %c0_2] : memref<1408x256xbf16, #tpu.memory_space<vmem>>, vector<128x256xbf16>
    %c0_3 = arith.constant 0 : index
    %c0_4 = arith.constant 0 : index
    %2 = vector.load %arg3[%c0_3, %c0_4] : memref<8x256xf32, #tpu.memory_space<vmem>>, vector<1x256xf32>
    %3 = arith.truncf %0 : vector<8x128xf32> to vector<8x128xbf16>
    %cst = arith.constant dense<0.000000e+00> : vector<8x256xf32>
    %4 = tpu.matmul %3, %1, %cst {dimension_numbers = #tpu.dot_dimension_numbers<[1], [0], [0], [1], [0, 0, 1, 1], [], []>} : vector<8x128xbf16>, vector<128x256xbf16>, vector<8x256xf32> -> vector<8x256xf32>
    %5 = vector.broadcast %2 : vector<1x256xf32> to vector<8x256xf32>
    %6 = arith.addf %4, %5 : vector<8x256xf32>
    %cst_5 = arith.constant 0.000000e+00 : f32
    %7 = vector.broadcast %cst_5 : f32 to vector<8x256xf32>
    %8 = arith.maximumf %6, %7 : vector<8x256xf32>
    %c128 = arith.constant 128 : index
    %c0_6 = arith.constant 0 : index
    %9 = vector.load %arg2[%c128, %c0_6] : memref<1408x256xbf16, #tpu.memory_space<vmem>>, vector<256x256xbf16>
    %c1 = arith.constant 1 : index
    %c0_7 = arith.constant 0 : index
    %10 = vector.load %arg3[%c1, %c0_7] : memref<8x256xf32, #tpu.memory_space<vmem>>, vector<1x256xf32>
    %11 = arith.truncf %8 : vector<8x256xf32> to vector<8x256xbf16>
    %cst_8 = arith.constant dense<0.000000e+00> : vector<8x256xf32>
    %12 = tpu.matmul %11, %9, %cst_8 {dimension_numbers = #tpu.dot_dimension_numbers<[1], [0], [0], [1], [0, 0, 1, 1], [], []>} : vector<8x256xbf16>, vector<256x256xbf16>, vector<8x256xf32> -> vector<8x256xf32>
    %13 = vector.broadcast %10 : vector<1x256xf32> to vector<8x256xf32>
    %14 = arith.addf %12, %13 : vector<8x256xf32>
    %cst_9 = arith.constant 0.000000e+00 : f32
    %15 = vector.broadcast %cst_9 : f32 to vector<8x256xf32>
    %16 = arith.maximumf %14, %15 : vector<8x256xf32>
    %c384 = arith.constant 384 : index
    %c0_10 = arith.constant 0 : index
    %17 = vector.load %arg2[%c384, %c0_10] : memref<1408x256xbf16, #tpu.memory_space<vmem>>, vector<256x256xbf16>
    %c2 = arith.constant 2 : index
    %c0_11 = arith.constant 0 : index
    %18 = vector.load %arg3[%c2, %c0_11] : memref<8x256xf32, #tpu.memory_space<vmem>>, vector<1x256xf32>
    %19 = arith.truncf %16 : vector<8x256xf32> to vector<8x256xbf16>
    %cst_12 = arith.constant dense<0.000000e+00> : vector<8x256xf32>
    %20 = tpu.matmul %19, %17, %cst_12 {dimension_numbers = #tpu.dot_dimension_numbers<[1], [0], [0], [1], [0, 0, 1, 1], [], []>} : vector<8x256xbf16>, vector<256x256xbf16>, vector<8x256xf32> -> vector<8x256xf32>
    %21 = vector.broadcast %18 : vector<1x256xf32> to vector<8x256xf32>
    %22 = arith.addf %20, %21 : vector<8x256xf32>
    %cst_13 = arith.constant 0.000000e+00 : f32
    %23 = vector.broadcast %cst_13 : f32 to vector<8x256xf32>
    %24 = arith.maximumf %22, %23 : vector<8x256xf32>
    %c640 = arith.constant 640 : index
    %c0_14 = arith.constant 0 : index
    %25 = vector.load %arg2[%c640, %c0_14] : memref<1408x256xbf16, #tpu.memory_space<vmem>>, vector<256x128xbf16>
    %c3 = arith.constant 3 : index
    %c0_15 = arith.constant 0 : index
    %26 = vector.load %arg3[%c3, %c0_15] : memref<8x256xf32, #tpu.memory_space<vmem>>, vector<1x128xf32>
    %27 = arith.truncf %24 : vector<8x256xf32> to vector<8x256xbf16>
    %cst_16 = arith.constant dense<0.000000e+00> : vector<8x128xf32>
    %28 = tpu.matmul %27, %25, %cst_16 {dimension_numbers = #tpu.dot_dimension_numbers<[1], [0], [0], [1], [0, 0, 1, 1], [], []>} : vector<8x256xbf16>, vector<256x128xbf16>, vector<8x128xf32> -> vector<8x128xf32>
    %29 = vector.broadcast %26 : vector<1x128xf32> to vector<8x128xf32>
    %30 = arith.addf %28, %29 : vector<8x128xf32>
    %cst_17 = arith.constant 0.000000e+00 : f32
    %31 = vector.broadcast %cst_17 : f32 to vector<8x128xf32>
    %32 = arith.maximumf %30, %31 : vector<8x128xf32>
    %c896 = arith.constant 896 : index
    %c0_18 = arith.constant 0 : index
    %33 = vector.load %arg2[%c896, %c0_18] : memref<1408x256xbf16, #tpu.memory_space<vmem>>, vector<128x128xbf16>
    %c4 = arith.constant 4 : index
    %c0_19 = arith.constant 0 : index
    %34 = vector.load %arg3[%c4, %c0_19] : memref<8x256xf32, #tpu.memory_space<vmem>>, vector<1x128xf32>
    %35 = arith.truncf %32 : vector<8x128xf32> to vector<8x128xbf16>
    %cst_20 = arith.constant dense<0.000000e+00> : vector<8x128xf32>
    %36 = tpu.matmul %35, %33, %cst_20 {dimension_numbers = #tpu.dot_dimension_numbers<[1], [0], [0], [1], [0, 0, 1, 1], [], []>} : vector<8x128xbf16>, vector<128x128xbf16>, vector<8x128xf32> -> vector<8x128xf32>
    %37 = vector.broadcast %34 : vector<1x128xf32> to vector<8x128xf32>
    %38 = arith.addf %36, %37 : vector<8x128xf32>
    %cst_21 = arith.constant 0.000000e+00 : f32
    %39 = vector.broadcast %cst_21 : f32 to vector<8x128xf32>
    %40 = arith.maximumf %38, %39 : vector<8x128xf32>
    %c1024 = arith.constant 1024 : index
    %c0_22 = arith.constant 0 : index
    %41 = vector.load %arg2[%c1024, %c0_22] : memref<1408x256xbf16, #tpu.memory_space<vmem>>, vector<128x128xbf16>
    %c5 = arith.constant 5 : index
    %c0_23 = arith.constant 0 : index
    %42 = vector.load %arg3[%c5, %c0_23] : memref<8x256xf32, #tpu.memory_space<vmem>>, vector<1x128xf32>
    %43 = arith.truncf %40 : vector<8x128xf32> to vector<8x128xbf16>
    %cst_24 = arith.constant dense<0.000000e+00> : vector<8x128xf32>
    %44 = tpu.matmul %43, %41, %cst_24 {dimension_numbers = #tpu.dot_dimension_numbers<[1], [0], [0], [1], [0, 0, 1, 1], [], []>} : vector<8x128xbf16>, vector<128x128xbf16>, vector<8x128xf32> -> vector<8x128xf32>
    %45 = vector.broadcast %42 : vector<1x128xf32> to vector<8x128xf32>
    %46 = arith.addf %44, %45 : vector<8x128xf32>
    %cst_25 = arith.constant 0.000000e+00 : f32
    %47 = vector.broadcast %cst_25 : f32 to vector<8x128xf32>
    %48 = arith.maximumf %46, %47 : vector<8x128xf32>
    %c1152 = arith.constant 1152 : index
    %c0_26 = arith.constant 0 : index
    %49 = vector.load %arg2[%c1152, %c0_26] : memref<1408x256xbf16, #tpu.memory_space<vmem>>, vector<128x128xbf16>
    %c6 = arith.constant 6 : index
    %c0_27 = arith.constant 0 : index
    %50 = vector.load %arg3[%c6, %c0_27] : memref<8x256xf32, #tpu.memory_space<vmem>>, vector<1x128xf32>
    %51 = arith.truncf %48 : vector<8x128xf32> to vector<8x128xbf16>
    %cst_28 = arith.constant dense<0.000000e+00> : vector<8x128xf32>
    %52 = tpu.matmul %51, %49, %cst_28 {dimension_numbers = #tpu.dot_dimension_numbers<[1], [0], [0], [1], [0, 0, 1, 1], [], []>} : vector<8x128xbf16>, vector<128x128xbf16>, vector<8x128xf32> -> vector<8x128xf32>
    %53 = vector.broadcast %50 : vector<1x128xf32> to vector<8x128xf32>
    %54 = arith.addf %52, %53 : vector<8x128xf32>
    %cst_29 = arith.constant 0.000000e+00 : f32
    %55 = vector.broadcast %cst_29 : f32 to vector<8x128xf32>
    %56 = arith.maximumf %54, %55 : vector<8x128xf32>
    %c1280 = arith.constant 1280 : index
    %c0_30 = arith.constant 0 : index
    %57 = vector.load %arg2[%c1280, %c0_30] : memref<1408x256xbf16, #tpu.memory_space<vmem>>, vector<128x128xbf16>
    %c7 = arith.constant 7 : index
    %c0_31 = arith.constant 0 : index
    %58 = vector.load %arg3[%c7, %c0_31] : memref<8x256xf32, #tpu.memory_space<vmem>>, vector<1x128xf32>
    %59 = arith.truncf %56 : vector<8x128xf32> to vector<8x128xbf16>
    %cst_32 = arith.constant dense<0.000000e+00> : vector<8x128xf32>
    %60 = tpu.matmul %59, %57, %cst_32 {dimension_numbers = #tpu.dot_dimension_numbers<[1], [0], [0], [1], [0, 0, 1, 1], [], []>} : vector<8x128xbf16>, vector<128x128xbf16>, vector<8x128xf32> -> vector<8x128xf32>
    %61 = vector.broadcast %58 : vector<1x128xf32> to vector<8x128xf32>
    %62 = arith.addf %60, %61 : vector<8x128xf32>
    %cst_33 = arith.constant 0.000000e+00 : f32
    %63 = vector.broadcast %cst_33 : f32 to vector<8x128xf32>
    %64 = arith.subf %63, %62 : vector<8x128xf32>
    %65 = math.exp %64 : vector<8x128xf32>
    %cst_34 = arith.constant 1.000000e+00 : f32
    %66 = vector.broadcast %cst_34 : f32 to vector<8x128xf32>
    %67 = arith.addf %66, %65 : vector<8x128xf32>
    %cst_35 = arith.constant 1.000000e+00 : f32
    %68 = vector.broadcast %cst_35 : f32 to vector<8x128xf32>
    %69 = arith.divf %68, %67 : vector<8x128xf32>
    %c0_36 = arith.constant 0 : index
    %c0_37 = arith.constant 0 : index
    %70 = vector.load %arg4[%c0_36, %c0_37] : memref<8x128xf32, #tpu.memory_space<vmem>>, vector<8x128xf32>
    tpu.vector_store %arg4[%c0_36, %c0_37], %69 {strides = array<i32>} : memref<8x128xf32, #tpu.memory_space<vmem>>, vector<8x128xf32>,
    return
  }
  func.func @transform_0(%arg0: i32) -> (i32, i32) {
    %c0_i32 = arith.constant 0 : i32
    %c0_i32_0 = arith.constant 0 : i32
    return %arg0, %c0_i32 : i32, i32
  }
  func.func @transform_1(%arg0: i32) -> (i32, i32) {
    %c0_i32 = arith.constant 0 : i32
    %c0_i32_0 = arith.constant 0 : i32
    %c0_i32_1 = arith.constant 0 : i32
    return %c0_i32, %c0_i32_0 : i32, i32
  }
  func.func @transform_2(%arg0: i32) -> (i32, i32) {
    %c0_i32 = arith.constant 0 : i32
    %c0_i32_0 = arith.constant 0 : i32
    %c0_i32_1 = arith.constant 0 : i32
    return %c0_i32, %c0_i32_0 : i32, i32
  }
  func.func @transform_3(%arg0: i32) -> (i32, i32) {
    %c0_i32 = arith.constant 0 : i32
    %c0_i32_0 = arith.constant 0 : i32
    return %arg0, %c0_i32 : i32, i32
  }
}

</mosaic_0001>

<bundles_post_ra>
// kernel: tpu_custom_call.1
= control target key start
LH: loop header
LB: loop body
LE: loop exit
PB: predicated region body
PF: predicated region fallthrough
CT: control target
= control target key end

     0   :  { %8 = vsyncpa [#allocation3], 0  ;;  %s1996_s0 = inlined_call_operand.hbm [shape: f32[8,128], index: 0, kind: input, shape index: {}]   ;;  %s1997_s1 = inlined_call_operand.hbm [shape: bf16[1408,256], index: 1, kind: input, shape index: {}]   ;;  %s1998_s2 = inlined_call_operand.hbm [shape: f32[8,256], index: 2, kind: input, shape index: {}]   ;;  %s1999_s3 = inlined_call_operand.hbm [shape: f32[8,128], index: 3, kind: output, shape index: {}]  }
   0x1   :  { %9 = vsyncpa [#allocation6], 0 }
   0x2   :  { %10 = vsyncpa [#allocation4], 0  ;;  %s1869_s12 = smov [#allocation5]   ;;  %s1775_s16 = scalar_lea.hbm %s1997_s1, 22528 }
   0x3   :  { %s26_s13 = sshll.u32 %s1869_s12, 4  ;;  %p1776_p0 = scmp.ne.s32.totalorder %s1997_s1, %s1775_s16  ;;  %s27_s13 = int_to_ptr.vmem [resolvable:$true] %s26_s13 }
   0x4   :  { %p1779_p1 = scmp.lt.u32.totalorder %s1775_s16, %s1997_s1 }
   0x6   :  { %p1781_p2 = pnand %p1779_p1, %p1776_p0 }
   0x8   :  { %1784 = shalt.err (!%p1781_p2)
}
   0x9   :  { %s1785_s21 = scalar_lea.vmem %s27_s13, 22528  ;;  %p1790_p4 = scmp.lt.s32.totalorder %s27_s13, %s27_s13 }
   0xa   :  { %p1786_p3 = scmp.ne.s32.totalorder %s27_s13, %s1785_s21  ;;  %p1791_p5 = scmp.lt.s32.totalorder %s1785_s21, %s1785_s21 }
   0xc   :  { %p1792_p6 = por %p1791_p5, %p1790_p4 }
   0xe   :  { %p1793_p7 = pnand %p1792_p6, %p1786_p3 }
  0x10   :  { %1796 = shalt.err (!%p1793_p7)
}
  0x11   :  { %s1870_s22 = smov 128   ;;  %s1871_s23 = smov 8  }
  0x12   :  { %32 = dma.hbm_to_vmem [thread:$0]  %s1997_s1, 22528, %s27_s13, [#allocation6], %s1870_s22, %s1870_s22, %s1871_s23  }
  0x13   :  { %s1872_s26 = smov [#allocation2]   ;;  %s1873_s28 = smov [#allocation7]  }
  0x14   :  { %s17_s27 = sshll.u32 %s1872_s26, 4  ;;  %s39_s29 = sshll.u32 %s1873_s28, 4  ;;  %s18_s27 = int_to_ptr.vmem [resolvable:$true] %s17_s27  ;;  %s40_s29 = int_to_ptr.vmem [resolvable:$true] %s39_s29 }
  0x15   :  { %s1797_s5 = scalar_lea.hbm %s1996_s0, 128 }
  0x16   :  { %p1798_p8 = scmp.ne.s32.totalorder %s1996_s0, %s1797_s5  ;;  %p1801_p9 = scmp.lt.u32.totalorder %s1797_s5, %s1996_s0 }
  0x18   :  { %p1803_p10 = pnand %p1801_p9, %p1798_p8 }
  0x1a   :  { %1806 = shalt.err (!%p1803_p10)
}
  0x1b   :  { %s1807_s1 = scalar_lea.vmem %s18_s27, 128  ;;  %p1812_p12 = scmp.lt.s32.totalorder %s18_s27, %s18_s27 }
  0x1c   :  { %p1808_p11 = scmp.ne.s32.totalorder %s18_s27, %s1807_s1  ;;  %p1813_p13 = scmp.lt.s32.totalorder %s1807_s1, %s1807_s1 }
  0x1e   :  { %p1814_p0 = por %p1813_p13, %p1812_p12 }
  0x20   :  { %p1815_p1 = pnand %p1814_p0, %p1808_p11 }
  0x22   :  { %1818 = shalt.err (!%p1815_p1)
}
  0x23   :  { %20 = dma.hbm_to_vmem [thread:$0]  %s1996_s0, 128, %s18_s27, [#allocation3]  }
  0x24   :  { %s1819_s14 = scalar_lea.hbm %s1998_s2, 256 }
  0x25   :  { %p1820_p2 = scmp.ne.s32.totalorder %s1998_s2, %s1819_s14  ;;  %p1823_p3 = scmp.lt.u32.totalorder %s1819_s14, %s1998_s2 }
  0x27   :  { %p1825_p4 = pnand %p1823_p3, %p1820_p2 }
  0x29   :  { %1828 = shalt.err (!%p1825_p4)
}
  0x2a   :  { %s1829_s19 = scalar_lea.vmem %s40_s29, 256  ;;  %p1834_p6 = scmp.lt.s32.totalorder %s40_s29, %s40_s29 }
  0x2b   :  { %p1830_p5 = scmp.ne.s32.totalorder %s40_s29, %s1829_s19  ;;  %p1835_p7 = scmp.lt.s32.totalorder %s1829_s19, %s1829_s19 }
  0x2d   :  { %p1836_p8 = por %p1835_p7, %p1834_p6 }
  0x2f   :  { %p1837_p9 = pnand %p1836_p8, %p1830_p5 }
  0x31   :  { %1840 = shalt.err (!%p1837_p9)
}
  0x32   :  { %42 = dma.hbm_to_vmem [thread:$0]  %s1998_s2, 256, %s40_s29, [#allocation6]  }
  0x33   :  { %1863 = dma.done.wait [#allocation3], 128  }
  0x34   :  { %1864 = vsyncadd [#allocation3], 4294967168 }
  0x35   :  { %1865 = dma.done.wait [#allocation6], 22784  }
  0x36   :  { %1866 = vsyncadd [#allocation6], 4294944512  ;;  %v1874_v0 = vmov 0   ;;  %v1603_v1 = vld [vmem:[#allocation5 + $0x4] ss:$8 sps:$4 sm:$0xff]   ;;  %v53_v26 = vld [vmem:[#allocation2] sm:$0xff] }
  0x37   :  { %195 = vmatprep.mubr.bf16.mxu0 %v1874_v0  ;;  %v1605_v2 = vld [vmem:[#allocation5] ss:$8 sps:$4 sm:$0xff]   ;;  %163 = vmatprep.subr.bf16.mxu0 %v1603_v1  ;;  %v1606_v3 = vld [vmem:[#allocation5 + $0x14] ss:$8 sps:$4 sm:$0xff]   ;;  %v1608_v4 = vld [vmem:[#allocation5 + $0x10] ss:$8 sps:$4 sm:$0xff]   ;;  %v71_v30 = vpack.c.bf16 %v53_v26, %v53_v26 }
  0x38   :  { %164 = vmatpush1.bf16.msra.mxu0 %v1605_v2  ;;  %v1609_v5 = vld [vmem:[#allocation5 + $0x24] ss:$8 sps:$4 sm:$0xff]   ;;  %v1611_v6 = vld [vmem:[#allocation5 + $0x20] ss:$8 sps:$4 sm:$0xff]   ;;  %v1612_v7 = vld [vmem:[#allocation5 + $0x34] ss:$8 sps:$4 sm:$0xff]  }
  0x39   :  { %165 = vmatprep.subr.bf16.mxu0 %v1606_v3  ;;  %v1614_v8 = vld [vmem:[#allocation5 + $0x30] ss:$8 sps:$4 sm:$0xff]   ;;  %v1615_v9 = vld [vmem:[#allocation5 + $0x44] ss:$8 sps:$4 sm:$0xff]   ;;  %v1629_v11 = vld [vmem:[#allocation5 + $0x80] ss:$8 sps:$4 sm:$0xff]  }
  0x3a   :  { %v1627_v10 = vld [vmem:[#allocation5 + $0x84] ss:$8 sps:$4 sm:$0xff]   ;;  %v1630_v12 = vld [vmem:[#allocation5 + $0x94] ss:$8 sps:$4 sm:$0xff]   ;;  %v1617_v13 = vld [vmem:[#allocation5 + $0x40] ss:$8 sps:$4 sm:$0xff]  }
  0x3b   :  { %413 = vmatprep.subr.bf16.mxu1 %v1627_v10  ;;  %v1632_v14 = vld [vmem:[#allocation5 + $0x90] ss:$8 sps:$4 sm:$0xff]   ;;  %v1633_v15 = vld [vmem:[#allocation5 + $0xa4] ss:$8 sps:$4 sm:$0xff]   ;;  %v1618_v16 = vld [vmem:[#allocation5 + $0x54] ss:$8 sps:$4 sm:$0xff]  }
  0x3c   :  { %166 = vmatpush1.bf16.msra.mxu0 %v1608_v4  ;;  %414 = vmatpush1.bf16.msra.mxu1 %v1629_v11  ;;  %v1620_v17 = vld [vmem:[#allocation5 + $0x50] ss:$8 sps:$4 sm:$0xff]   ;;  %v1635_v18 = vld [vmem:[#allocation5 + $0xa0] ss:$8 sps:$4 sm:$0xff]   ;;  %v1636_v19 = vld [vmem:[#allocation5 + $0xb4] ss:$8 sps:$4 sm:$0xff]  }
  0x3d   :  { %167 = vmatprep.subr.bf16.mxu0 %v1609_v5  ;;  %415 = vmatprep.subr.bf16.mxu1 %v1630_v12  ;;  %v1621_v20 = vld [vmem:[#allocation5 + $0x64] ss:$8 sps:$4 sm:$0xff]   ;;  %v1623_v21 = vld [vmem:[#allocation5 + $0x60] ss:$8 sps:$4 sm:$0xff]   ;;  %v1638_v22 = vld [vmem:[#allocation5 + $0xb0] ss:$8 sps:$4 sm:$0xff]  }
  0x3e   :  { %v1639_v23 = vld [vmem:[#allocation5 + $0xc4] ss:$8 sps:$4 sm:$0xff]   ;;  %v1624_v24 = vld [vmem:[#allocation5 + $0x74] ss:$8 sps:$4 sm:$0xff]   ;;  %v1626_v25 = vld [vmem:[#allocation5 + $0x70] ss:$8 sps:$4 sm:$0xff]  }
  0x3f   :  { %v1641_v27 = vld [vmem:[#allocation5 + $0xc0] ss:$8 sps:$4 sm:$0xff]   ;;  %v1642_v28 = vld [vmem:[#allocation5 + $0xd4] ss:$8 sps:$4 sm:$0xff]   ;;  %v1644_v29 = vld [vmem:[#allocation5 + $0xd0] ss:$8 sps:$4 sm:$0xff]  }
  0x40   :  { %168 = vmatpush1.bf16.msra.mxu0 %v1611_v6  ;;  %416 = vmatpush1.bf16.msra.mxu1 %v1632_v14  ;;  %v1645_v31 = vld [vmem:[#allocation5 + $0xe4] ss:$8 sps:$4 sm:$0xff]   ;;  %v1647_v32 = vld [vmem:[#allocation5 + $0xe0] ss:$8 sps:$4 sm:$0xff]   ;;  %v1648_v33 = vld [vmem:[#allocation5 + $0xf4] ss:$8 sps:$4 sm:$0xff]  }
  0x41   :  { %169 = vmatprep.subr.bf16.mxu0 %v1612_v7  ;;  %417 = vmatprep.subr.bf16.mxu1 %v1633_v15  ;;  %v1650_v34 = vld [vmem:[#allocation5 + $0xf0] ss:$8 sps:$4 sm:$0xff]   ;;  %v1651_v35 = vld [vmem:[#allocation5 + $0x104] ss:$8 sps:$4 sm:$0xff]   ;;  %v1653_v36 = vld [vmem:[#allocation5 + $0x100] ss:$8 sps:$4 sm:$0xff]   ;;  %v73_v15 = vlaneseq }
  0x42   :  { %v1654_v37 = vld [vmem:[#allocation5 + $0x114] ss:$8 sps:$4 sm:$0xff]   ;;  %v1656_v38 = vld [vmem:[#allocation5 + $0x110] ss:$8 sps:$4 sm:$0xff]   ;;  %v1657_v39 = vld [vmem:[#allocation5 + $0x124] ss:$8 sps:$4 sm:$0xff]  }
  0x43   :  { %v1659_v40 = vld [vmem:[#allocation5 + $0x120] ss:$8 sps:$4 sm:$0xff]   ;;  %v1660_v41 = vld [vmem:[#allocation5 + $0x134] ss:$8 sps:$4 sm:$0xff]   ;;  %v1662_v42 = vld [vmem:[#allocation5 + $0x130] ss:$8 sps:$4 sm:$0xff]  }
  0x44   :  { %170 = vmatpush1.bf16.msra.mxu0 %v1614_v8  ;;  %418 = vmatpush1.bf16.msra.mxu1 %v1635_v18  ;;  %v1663_v43 = vld [vmem:[#allocation5 + $0x144] ss:$8 sps:$4 sm:$0xff]   ;;  %v1665_v44 = vld [vmem:[#allocation5 + $0x140] ss:$8 sps:$4 sm:$0xff]   ;;  %v1666_v45 = vld [vmem:[#allocation5 + $0x154] ss:$8 sps:$4 sm:$0xff]  }
  0x45   :  { %171 = vmatprep.subr.bf16.mxu0 %v1615_v9  ;;  %419 = vmatprep.subr.bf16.mxu1 %v1636_v19  ;;  %v1668_v46 = vld [vmem:[#allocation5 + $0x150] ss:$8 sps:$4 sm:$0xff]   ;;  %v1669_v47 = vld [vmem:[#allocation5 + $0x164] ss:$8 sps:$4 sm:$0xff]   ;;  %v1671_v48 = vld [vmem:[#allocation5 + $0x160] ss:$8 sps:$4 sm:$0xff]  }
  0x46   :  { %v1672_v49 = vld [vmem:[#allocation5 + $0x174] ss:$8 sps:$4 sm:$0xff]   ;;  %v1674_v50 = vld [vmem:[#allocation5 + $0x170] ss:$8 sps:$4 sm:$0xff]   ;;  %v1675_v51 = vld [vmem:[#allocation5 + $0x180] ss:$8 sps:$4 sm:$0xff]  }
  0x47   :  { %v1677_v52 = vld [vmem:[#allocation5 + $0x184] ss:$8 sps:$4 sm:$0xff]   ;;  %v1680_v53 = vld [vmem:[#allocation5 + $0x194] ss:$8 sps:$4 sm:$0xff]   ;;  %v1678_v54 = vld [vmem:[#allocation5 + $0x190] ss:$8 sps:$4 sm:$0xff]  }
  0x48   :  { %172 = vmatpush1.bf16.msra.mxu0 %v1617_v13  ;;  %420 = vmatpush1.bf16.msra.mxu1 %v1638_v22  ;;  %v1683_v55 = vld [vmem:[#allocation5 + $0x1a4] ss:$8 sps:$4 sm:$0xff]   ;;  %v1681_v56 = vld [vmem:[#allocation5 + $0x1a0] ss:$8 sps:$4 sm:$0xff]   ;;  %v1686_v57 = vld [vmem:[#allocation5 + $0x1b4] ss:$8 sps:$4 sm:$0xff]  }
  0x49   :  { %173 = vmatprep.subr.bf16.mxu0 %v1618_v16  ;;  %421 = vmatprep.subr.bf16.mxu1 %v1639_v23  ;;  %v1684_v58 = vld [vmem:[#allocation5 + $0x1b0] ss:$8 sps:$4 sm:$0xff]   ;;  %v1689_v59 = vld [vmem:[#allocation5 + $0x1c4] ss:$8 sps:$4 sm:$0xff]   ;;  %v1687_v60 = vld [vmem:[#allocation5 + $0x1c0] ss:$8 sps:$4 sm:$0xff]  }
  0x4a   :  { %v1692_v61 = vld [vmem:[#allocation5 + $0x1d4] ss:$8 sps:$4 sm:$0xff]   ;;  %v1690_v62 = vld [vmem:[#allocation5 + $0x1d0] ss:$8 sps:$4 sm:$0xff]   ;;  %v1695_v63 = vld [vmem:[#allocation5 + $0x1e4] ss:$8 sps:$4 sm:$0xff]  }
  0x4b   :  { %v1693_v0 = vld [vmem:[#allocation5 + $0x1e0] ss:$8 sps:$4 sm:$0xff]   ;;  %v1698_v1 = vld [vmem:[#allocation5 + $0x1f4] ss:$8 sps:$4 sm:$0xff]   ;;  %v1696_v2 = vld [vmem:[#allocation5 + $0x1f0] ss:$8 sps:$4 sm:$0xff]  }
  0x4c   :  { %174 = vmatpush1.bf16.msra.mxu0 %v1620_v17  ;;  %422 = vmatpush1.bf16.msra.mxu1 %v1641_v27  ;;  %v1701_v3 = vld [vmem:[#allocation5 + $0x204] ss:$8 sps:$4 sm:$0xff]   ;;  %v1699_v4 = vld [vmem:[#allocation5 + $0x200] ss:$8 sps:$4 sm:$0xff]   ;;  %v1704_v5 = vld [vmem:[#allocation5 + $0x214] ss:$8 sps:$4 sm:$0xff]  }
  0x4d   :  { %175 = vmatprep.subr.bf16.mxu0 %v1621_v20  ;;  %423 = vmatprep.subr.bf16.mxu1 %v1642_v28  ;;  %v1702_v6 = vld [vmem:[#allocation5 + $0x210] ss:$8 sps:$4 sm:$0xff]   ;;  %v1707_v7 = vld [vmem:[#allocation5 + $0x224] ss:$8 sps:$4 sm:$0xff]   ;;  %v1705_v8 = vld [vmem:[#allocation5 + $0x220] ss:$8 sps:$4 sm:$0xff]  }
  0x4e   :  { %v1710_v9 = vld [vmem:[#allocation5 + $0x234] ss:$8 sps:$4 sm:$0xff]   ;;  %v1708_v10 = vld [vmem:[#allocation5 + $0x230] ss:$8 sps:$4 sm:$0xff]   ;;  %v1713_v11 = vld [vmem:[#allocation5 + $0x244] ss:$8 sps:$4 sm:$0xff]  }
  0x4f   :  { %v1711_v12 = vld [vmem:[#allocation5 + $0x240] ss:$8 sps:$4 sm:$0xff]   ;;  %v1716_v13 = vld [vmem:[#allocation5 + $0x254] ss:$8 sps:$4 sm:$0xff]   ;;  %v1714_v14 = vld [vmem:[#allocation5 + $0x250] ss:$8 sps:$4 sm:$0xff]  }
  0x50   :  { %176 = vmatpush1.bf16.msra.mxu0 %v1623_v21  ;;  %424 = vmatpush1.bf16.msra.mxu1 %v1644_v29  ;;  %v74_v16 = vshrl.u32 %v73_v15, 7  ;;  %v70_v18 = vld [vmem:[#allocation7] ss:$8 sm:$0x3]  ;;  %vm1876_vm0 = vmmov 0   ;;  %s1877_s2 = smov [#allocation8]  }
  0x51   :  { %177 = vmatprep.subr.bf16.mxu0 %v1624_v24  ;;  %425 = vmatprep.subr.bf16.mxu1 %v1645_v31  ;;  %s1318_s21 = sshll.u32 %s1877_s2, 4  ;;  %s1319_s21 = int_to_ptr.vmem [resolvable:$true] %s1318_s21 }
  0x52   :  { %v1934_v17 = vsub.s32 0, %v74_v16  ;;  %v1936_v19 = vsub.s32 1, %v74_v16  ;;  %s1841_s22 = scalar_lea.vmem %s1319_s21, 128  ;;  %p1846_p11 = scmp.lt.s32.totalorder %s1319_s21, %s1319_s21 }
  0x53   :  { %p1842_p10 = scmp.ne.s32.totalorder %s1319_s21, %s1841_s22  ;;  %p1847_p12 = scmp.lt.s32.totalorder %s1841_s22, %s1841_s22 }
  0x54   :  { %178 = vmatpush1.bf16.msra.mxu0 %v1626_v25  ;;  %426 = vmatpush1.bf16.msra.mxu1 %v1647_v32  ;;  %v76_v20 = vrot.slane %v70_v18, %v1934_v17  ;;  %v80_v21 = vrot.slane %v70_v18, %v1936_v19  ;;  %v1719_v32 = vld [vmem:[#allocation5 + $0x264] ss:$8 sps:$4 sm:$0xff]  }
  0x55   :  { %427 = vmatprep.subr.bf16.mxu1 %v1648_v33  ;;  %663 = vmatprep.subr.bf16.mxu0 %v1677_v52  ;;  %v1717_v33 = vld [vmem:[#allocation5 + $0x260] ss:$8 sps:$4 sm:$0xff]   ;;  %p1848_p13 = por %p1847_p12, %p1846_p11 }
  0x57   :  { %196 = vmatmul.mubr.bf16.vlgmr.msra.gmra.mrb[0].mxu0 %v71_v30  ;;  %p1849_p0 = pnand %p1848_p13, %p1842_p10 }
  0x58   :  { %428 = vmatpush1.bf16.msra.mxu1 %v1650_v34  ;;  %664 = vmatpush1.bf16.msra.mxu0 %v1675_v51  ;;  %v1722_v34 = vld [vmem:[#allocation5 + $0x274] ss:$8 sps:$4 sm:$0xff]  }
  0x59   :  { %429 = vmatprep.subr.bf16.mxu1 %v1651_v35  ;;  %665 = vmatprep.subr.bf16.mxu0 %v1680_v53  ;;  %v1720_v35 = vld [vmem:[#allocation5 + $0x270] ss:$8 sps:$4 sm:$0xff]  }
  0x5c   :  { %430 = vmatpush1.bf16.msra.mxu1 %v1653_v36  ;;  %666 = vmatpush1.bf16.msra.mxu0 %v1678_v54  ;;  %v1723_v36 = vld [vmem:[#allocation5 + $0x300] ss:$8 sps:$4 sm:$0xff]  }
  0x5d   :  { %431 = vmatprep.subr.bf16.mxu1 %v1654_v37  ;;  %667 = vmatprep.subr.bf16.mxu0 %v1683_v55  ;;  %v1724_v37 = vld [vmem:[#allocation5 + $0x280] ss:$8 sps:$4 sm:$0xff]  }
  0x60   :  { %432 = vmatpush1.bf16.msra.mxu1 %v1656_v38  ;;  %668 = vmatpush1.bf16.msra.mxu0 %v1681_v56  ;;  %v1725_v38 = vld [vmem:[#allocation5 + $0x310] ss:$8 sps:$4 sm:$0xff]  }
  0x61   :  { %433 = vmatprep.subr.bf16.mxu1 %v1657_v39  ;;  %669 = vmatprep.subr.bf16.mxu0 %v1686_v57  ;;  %v1726_v39 = vld [vmem:[#allocation5 + $0x290] ss:$8 sps:$4 sm:$0xff]  }
  0x64   :  { %434 = vmatpush1.bf16.msra.mxu1 %v1659_v40  ;;  %670 = vmatpush1.bf16.msra.mxu0 %v1684_v58  ;;  %v1727_v40 = vld [vmem:[#allocation5 + $0x320] ss:$8 sps:$4 sm:$0xff]  }
  0x65   :  { %435 = vmatprep.subr.bf16.mxu1 %v1660_v41  ;;  %671 = vmatprep.subr.bf16.mxu0 %v1689_v59  ;;  %v1728_v41 = vld [vmem:[#allocation5 + $0x2a0] ss:$8 sps:$4 sm:$0xff]  }
  0x68   :  { %436 = vmatpush1.bf16.msra.mxu1 %v1662_v42  ;;  %672 = vmatpush1.bf16.msra.mxu0 %v1687_v60  ;;  %v1729_v42 = vld [vmem:[#allocation5 + $0x330] ss:$8 sps:$4 sm:$0xff]  }
  0x69   :  { %437 = vmatprep.subr.bf16.mxu1 %v1663_v43  ;;  %673 = vmatprep.subr.bf16.mxu0 %v1692_v61  ;;  %v1730_v43 = vld [vmem:[#allocation5 + $0x2b0] ss:$8 sps:$4 sm:$0xff]   ;;  %v1735_v61 = vld [vmem:[#allocation5 + $0x360] ss:$8 sps:$4 sm:$0xff]  }
  0x6c   :  { %438 = vmatpush1.bf16.msra.mxu1 %v1665_v44  ;;  %674 = vmatpush1.bf16.msra.mxu0 %v1690_v62  ;;  %v1731_v44 = vld [vmem:[#allocation5 + $0x340] ss:$8 sps:$4 sm:$0xff]  }
  0x6d   :  { %439 = vmatprep.subr.bf16.mxu1 %v1666_v45  ;;  %675 = vmatprep.subr.bf16.mxu0 %v1695_v63  ;;  %v1732_v45 = vld [vmem:[#allocation5 + $0x2c0] ss:$8 sps:$4 sm:$0xff]   ;;  %v1737_v63 = vld [vmem:[#allocation5 + $0x370] ss:$8 sps:$4 sm:$0xff]  }
  0x6e   :  { %v1736_v62 = vld [vmem:[#allocation5 + $0x2e0] ss:$8 sps:$4 sm:$0xff]  }
  0x70   :  { %440 = vmatpush1.bf16.msra.mxu1 %v1668_v46  ;;  %676 = vmatpush1.bf16.msra.mxu0 %v1693_v0  ;;  %v1733_v46 = vld [vmem:[#allocation5 + $0x350] ss:$8 sps:$4 sm:$0xff]  }
  0x71   :  { %441 = vmatprep.subr.bf16.mxu1 %v1669_v47  ;;  %677 = vmatprep.subr.bf16.mxu0 %v1698_v1  ;;  %v1734_v47 = vld [vmem:[#allocation5 + $0x2d0] ss:$8 sps:$4 sm:$0xff]   ;;  %v1739_v1 = vld [vmem:[#allocation5 + $0x380] ss:$8 sps:$4 sm:$0xff]  }
  0x72   :  { %v1738_v0 = vld [vmem:[#allocation5 + $0x2f0] ss:$8 sps:$4 sm:$0xff]  }
  0x74   :  { %442 = vmatpush1.bf16.msra.mxu1 %v1671_v48  ;;  %678 = vmatpush1.bf16.msra.mxu0 %v1696_v2  ;;  %v239_v48 = vld [vmem:[#allocation7 + $0x1] ss:$8 sm:$0x3]  ;;  %v1875_v2 = vmov 0.0  }
  0x75   :  { %443 = vmatprep.subr.bf16.mxu1 %v1672_v49  ;;  %679 = vmatprep.subr.bf16.mxu0 %v1701_v3  ;;  %v246_v49 = vrot.slane %v239_v48, %v1934_v17  ;;  %v1740_v3 = vld [vmem:[#allocation5 + $0x390] ss:$8 sps:$4 sm:$0xff]  }
  0x78   :  { %444 = vmatpush1.bf16.msra.mxu1 %v1674_v50  ;;  %680 = vmatpush1.bf16.msra.mxu0 %v1699_v4  ;;  %v250_v50 = vrot.slane %v239_v48, %v1936_v19  ;;  %v1741_v4 = vld [vmem:[#allocation5 + $0x3a0] ss:$8 sps:$4 sm:$0xff]  }
  0x79   :  { %681 = vmatprep.subr.bf16.mxu0 %v1704_v5  ;;  %1456 = vmatprep.subr.bf16.mxu1 %v1723_v36  ;;  %v1742_v5 = vld [vmem:[#allocation5 + $0x3b0] ss:$8 sps:$4 sm:$0xff]  }
  0x7c   :  { %682 = vmatpush1.bf16.msra.mxu0 %v1702_v6  ;;  %v1743_v6 = vld [vmem:[#allocation5 + $0x3c0] ss:$8 sps:$4 sm:$0xff]  }
  0x7d   :  { %683 = vmatprep.subr.bf16.mxu0 %v1707_v7  ;;  %v1744_v7 = vld [vmem:[#allocation5 + $0x3d0] ss:$8 sps:$4 sm:$0xff]  }
  0x80   :  { %684 = vmatpush1.bf16.msra.mxu0 %v1705_v8  ;;  %v489_v8 = vld [vmem:[#allocation7 + $0x2] ss:$8 sm:$0x3] }
  0x81   :  { %685 = vmatprep.subr.bf16.mxu0 %v1710_v9  ;;  %v496_v9 = vrot.slane %v489_v8, %v1934_v17  ;;  %v1747_v17 = vld [vmem:[#allocation5 + $0x400] ss:$8 sps:$4 sm:$0xff]  }
  0x84   :  { %686 = vmatpush1.bf16.msra.mxu0 %v1708_v10  ;;  %v500_v10 = vrot.slane %v489_v8, %v1936_v19  ;;  %v1748_v19 = vld [vmem:[#allocation5 + $0x410] ss:$8 sps:$4 sm:$0xff]  }
  0x85   :  { %687 = vmatprep.subr.bf16.mxu0 %v1713_v11  ;;  %v1770_v8 = vld [vmem:[#allocation5 + $0x570] ss:$8 sps:$4 sm:$0xff]  }
  0x88   :  { %688 = vmatpush1.bf16.msra.mxu0 %v1711_v12 }
  0x89   :  { %689 = vmatprep.subr.bf16.mxu0 %v1716_v13 }
  0x8c   :  { %690 = vmatpush1.bf16.msra.mxu0 %v1714_v14 }
  0x8d   :  { %691 = vmatprep.subr.bf16.mxu0 %v1719_v32 }
  0x90   :  { %692 = vmatpush1.bf16.msra.mxu0 %v1717_v33 }
  0x91   :  { %693 = vmatprep.subr.bf16.mxu0 %v1722_v34 }
  0x94   :  { %694 = vmatpush1.bf16.msra.mxu0 %v1720_v35 }
  0x95   :  { %1514 = vmatprep.subr.bf16.mxu0 %v1875_v2 }
 0x12a   :  { %v197_v22 = vpop.f32.mrb[0].mxu0 }
 0x12b   :  { %v198_v23 = vadd.f32 %v197_v22, %v76_v20  ;;  %v199_v24 = vpop.f32.mrb[1].mxu0 }
 0x12c   :  { %v200_v25 = vadd.f32 %v199_v24, %v80_v21  ;;  %v201_v26 = vpop.f32.mrb[2].mxu0  ;;  %v1746_v24 = vld [vmem:[#allocation5 + $0x3f0] ss:$8 sps:$4 sm:$0xff]  }
 0x12d   :  { %v204_v27 = vmax.f32 %v198_v23, 0.0  ;;  %v202_v28 = vpop.f32.mrb[3].mxu0  ;;  %v1745_v23 = vld [vmem:[#allocation5 + $0x3e0] ss:$8 sps:$4 sm:$0xff]   ;;  %v1750_v26 = vld [vmem:[#allocation5 + $0x430] ss:$8 sps:$4 sm:$0xff]  }
 0x12e   :  { %v205_v29 = vmax.f32 %v200_v25, 0.0  ;;  %v1749_v25 = vld [vmem:[#allocation5 + $0x420] ss:$8 sps:$4 sm:$0xff]   ;;  %v1752_v28 = vld [vmem:[#allocation5 + $0x450] ss:$8 sps:$4 sm:$0xff]  }
 0x12f   :  { %v240_v31 = vpack.c.bf16 %v204_v27, %v204_v27  ;;  %v1751_v27 = vld [vmem:[#allocation5 + $0x440] ss:$8 sps:$4 sm:$0xff]  }
 0x130   :  { %v241_v30 = vpack.c.bf16 %v205_v29, %v205_v29 }
 0x132   :  { %445 = vmatprep.mubr.bf16.mxu1 %v241_v30  ;;  %v738_v30 = vld [vmem:[#allocation7 + $0x3] ss:$0 sm:$0xff] }
 0x133   :  { %446 = vmatmul.mubr.bf16.vlgmr.msra.gmra.mrb[0].mxu1 %v240_v31 }
 0x134   :  { %1457 = vmatpush3.bf16.msra.mxu1 %v1724_v37 }
 0x135   :  { %1458 = vmatprep.subr.bf16.mxu1 %v1725_v38  ;;  %v1753_v38 = vld [vmem:[#allocation5 + $0x460] ss:$8 sps:$4 sm:$0xff]  }
 0x138   :  { %1459 = vmatpush3.bf16.msra.mxu1 %v1726_v39  ;;  %v1754_v39 = vld [vmem:[#allocation5 + $0x470] ss:$8 sps:$4 sm:$0xff]  }
 0x139   :  { %1460 = vmatprep.subr.bf16.mxu1 %v1727_v40  ;;  %v1755_v40 = vld [vmem:[#allocation5 + $0x480] ss:$8 sps:$4 sm:$0xff]  }
 0x13c   :  { %1461 = vmatpush3.bf16.msra.mxu1 %v1728_v41  ;;  %v1756_v41 = vld [vmem:[#allocation5 + $0x490] ss:$8 sps:$4 sm:$0xff]  }
 0x13d   :  { %1462 = vmatprep.subr.bf16.mxu1 %v1729_v42  ;;  %v1757_v42 = vld [vmem:[#allocation5 + $0x4a0] ss:$8 sps:$4 sm:$0xff]  }
 0x140   :  { %1463 = vmatpush3.bf16.msra.mxu1 %v1730_v43  ;;  %v1758_v43 = vld [vmem:[#allocation5 + $0x4b0] ss:$8 sps:$4 sm:$0xff]  }
 0x141   :  { %1464 = vmatprep.subr.bf16.mxu1 %v1731_v44  ;;  %v1759_v44 = vld [vmem:[#allocation5 + $0x4c0] ss:$8 sps:$4 sm:$0xff]  }
 0x144   :  { %1465 = vmatpush3.bf16.msra.mxu1 %v1732_v45  ;;  %v1760_v45 = vld [vmem:[#allocation5 + $0x4d0] ss:$8 sps:$4 sm:$0xff]  }
 0x145   :  { %1466 = vmatprep.subr.bf16.mxu1 %v1733_v46  ;;  %v894_v46 = vld [vmem:[#allocation7 + $0x4] ss:$0 sm:$0xff] }
 0x148   :  { %1467 = vmatpush3.bf16.msra.mxu1 %v1734_v47 }
 0x149   :  { %1468 = vmatprep.subr.bf16.mxu1 %v1735_v61  ;;  %v1768_v61 = vld [vmem:[#allocation5 + $0x550] ss:$8 sps:$4 sm:$0xff]  }
 0x14c   :  { %1469 = vmatpush3.bf16.msra.mxu1 %v1736_v62  ;;  %v1001_v62 = vld [vmem:[#allocation7 + $0x5] ss:$0 sm:$0xff] }
 0x14d   :  { %1470 = vmatprep.subr.bf16.mxu1 %v1737_v63 }
 0x150   :  { %1471 = vmatpush3.bf16.msra.mxu1 %v1738_v0 }
 0x151   :  { %1534 = vmatprep.subr.bf16.mxu1 %v1875_v2 }
 0x206   :  { %v447_v51 = vpop.f32.mrb[0].mxu1 }
 0x207   :  { %v448_v52 = vadd.f32 %v447_v51, %v246_v49  ;;  %v449_v53 = vpop.f32.mrb[1].mxu1 }
 0x208   :  { %v450_v54 = vadd.f32 %v449_v53, %v250_v50  ;;  %v451_v55 = vpop.f32.mrb[2].mxu1 }
 0x209   :  { %v454_v56 = vmax.f32 %v448_v52, 0.0  ;;  %v452_v57 = vpop.f32.mrb[3].mxu1  ;;  %v1762_v55 = vld [vmem:[#allocation5 + $0x4f0] ss:$8 sps:$4 sm:$0xff]  }
 0x20a   :  { %v455_v58 = vmax.f32 %v450_v54, 0.0  ;;  %v1761_v54 = vld [vmem:[#allocation5 + $0x4e0] ss:$8 sps:$4 sm:$0xff]   ;;  %v1764_v57 = vld [vmem:[#allocation5 + $0x510] ss:$8 sps:$4 sm:$0xff]  }
 0x20b   :  { %v490_v60 = vpack.c.bf16 %v454_v56, %v454_v56  ;;  %v1763_v56 = vld [vmem:[#allocation5 + $0x500] ss:$8 sps:$4 sm:$0xff]  }
 0x20c   :  { %v491_v59 = vpack.c.bf16 %v455_v58, %v455_v58  ;;  %v1765_v58 = vld [vmem:[#allocation5 + $0x520] ss:$8 sps:$4 sm:$0xff]  }
 0x20e   :  { %695 = vmatprep.mubr.bf16.mxu0 %v491_v59  ;;  %v1766_v59 = vld [vmem:[#allocation5 + $0x530] ss:$8 sps:$4 sm:$0xff]  }
 0x20f   :  { %696 = vmatmul.mubr.bf16.vlgmr.msra.gmra.mrb[4].mxu0 %v490_v60  ;;  %v1767_v60 = vld [vmem:[#allocation5 + $0x540] ss:$8 sps:$4 sm:$0xff]  }
 0x210   :  { %1515 = vmatpush3.bf16.msra.mxu0 %v1739_v1  ;;  %1530 = vmatprep.mubr.msk.bf16.mxu0 %vm1876_vm0, %v1875_v2 }
 0x211   :  { %1516 = vmatprep.subr.bf16.mxu0 %v1875_v2 }
 0x214   :  { %1517 = vmatpush3.bf16.msra.mxu0 %v1740_v3 }
 0x215   :  { %1518 = vmatprep.subr.bf16.mxu0 %v1875_v2 }
 0x218   :  { %1519 = vmatpush3.bf16.msra.mxu0 %v1741_v4 }
 0x219   :  { %1520 = vmatprep.subr.bf16.mxu0 %v1875_v2 }
 0x21c   :  { %1521 = vmatpush3.bf16.msra.mxu0 %v1742_v5 }
 0x21d   :  { %1522 = vmatprep.subr.bf16.mxu0 %v1875_v2 }
 0x220   :  { %1523 = vmatpush3.bf16.msra.mxu0 %v1743_v6 }
 0x221   :  { %1524 = vmatprep.subr.bf16.mxu0 %v1875_v2 }
 0x224   :  { %1525 = vmatpush3.bf16.msra.mxu0 %v1744_v7  ;;  %v1769_v7 = vld [vmem:[#allocation5 + $0x560] ss:$8 sps:$4 sm:$0xff]  }
 0x225   :  { %1526 = vmatprep.subr.bf16.mxu0 %v1875_v2 }
 0x228   :  { %1527 = vmatpush3.bf16.msra.mxu0 %v1745_v23 }
 0x229   :  { %1528 = vmatprep.subr.bf16.mxu0 %v1875_v2 }
 0x22c   :  { %1529 = vmatpush3.bf16.msra.mxu0 %v1746_v24 }
 0x22d   :  { %1554 = vmatprep.subr.bf16.mxu0 %v1875_v2 }
 0x2e2   :  { %v697_v11 = vpop.f32.mrb[4].mxu0 }
 0x2e3   :  { %v698_v12 = vadd.f32 %v697_v11, %v496_v9  ;;  %v699_v13 = vpop.f32.mrb[5].mxu0  ;;  %v1108_v9 = vld [vmem:[#allocation7 + $0x6] ss:$0 sm:$0xff] }
 0x2e4   :  { %v700_v14 = vadd.f32 %v699_v13, %v500_v10  ;;  %v701_v15 = vpop.f32.mrb[6].mxu0 }
 0x2e5   :  { %v704_v16 = vmax.f32 %v698_v12, 0.0  ;;  %v702_v18 = vpop.f32.mrb[7].mxu0 }
 0x2e6   :  { %v705_v20 = vmax.f32 %v700_v14, 0.0  ;;  %v1215_v18 = vld [vmem:[#allocation7 + $0x7] ss:$0 sm:$0xff] }
 0x2e7   :  { %v739_v22 = vpack.c.bf16 %v704_v16, %v704_v16 }
 0x2e8   :  { %v740_v21 = vpack.c.bf16 %v705_v20, %v705_v20 }
 0x2ea   :  { %869 = vmatprep.mubr.bf16.mxu1 %v740_v21 }
 0x2eb   :  { %870 = vmatmul.mubr.bf16.vlgmr.msra.gmra.mrb[4].mxu1 %v739_v22 }
 0x2ec   :  { %1550 = vmatprep.mubr.msk.bf16.mxu1 %vm1876_vm0, %v1875_v2  ;;  %1535 = vmatpush3.bf16.msra.mxu1 %v1747_v17 }
 0x2ed   :  { %1536 = vmatprep.subr.bf16.mxu1 %v1875_v2 }
 0x2f0   :  { %1537 = vmatpush3.bf16.msra.mxu1 %v1748_v19 }
 0x2f1   :  { %1538 = vmatprep.subr.bf16.mxu1 %v1875_v2 }
 0x2f4   :  { %1539 = vmatpush3.bf16.msra.mxu1 %v1749_v25 }
 0x2f5   :  { %1540 = vmatprep.subr.bf16.mxu1 %v1875_v2 }
 0x2f8   :  { %1541 = vmatpush3.bf16.msra.mxu1 %v1750_v26 }
 0x2f9   :  { %1542 = vmatprep.subr.bf16.mxu1 %v1875_v2 }
 0x2fc   :  { %1543 = vmatpush3.bf16.msra.mxu1 %v1751_v27 }
 0x2fd   :  { %1544 = vmatprep.subr.bf16.mxu1 %v1875_v2 }
 0x300   :  { %1545 = vmatpush3.bf16.msra.mxu1 %v1752_v28 }
 0x301   :  { %1546 = vmatprep.subr.bf16.mxu1 %v1875_v2 }
 0x304   :  { %1547 = vmatpush3.bf16.msra.mxu1 %v1753_v38 }
 0x305   :  { %1548 = vmatprep.subr.bf16.mxu1 %v1875_v2 }
 0x308   :  { %1549 = vmatpush3.bf16.msra.mxu1 %v1754_v39 }
 0x309   :  { %1574 = vmatprep.subr.bf16.mxu1 %v1875_v2 }
 0x3be   :  { %v1472_v29 = vpop.f32.mrb[4].mxu1 }
 0x3bf   :  { %v1473_v31 = vpop.f32.mrb[5].mxu1 }
 0x3c0   :  { %v1474_v32 = vadd.f32 %v1473_v31, %v1472_v29  ;;  %v1475_v33 = vpop.f32.mrb[6].mxu1 }
 0x3c1   :  { %v1476_v34 = vpop.f32.mrb[7].mxu1 }
 0x3c2   :  { %v872_v35 = vadd.f32 %v1474_v32, %v738_v30 }
 0x3c4   :  { %v877_v36 = vmax.f32 %v872_v35, 0.0 }
 0x3c6   :  { %v895_v37 = vpack.c.bf16 %v877_v36, %v877_v36 }
 0x3c8   :  { %1531 = vmatmul.mubr.bf16.vlgmr.msra.gmra.mrb[8].mxu0 %v895_v37 }
 0x3c9   :  { %1570 = vmatprep.mubr.msk.bf16.mxu0 %vm1876_vm0, %v1875_v2  ;;  %1555 = vmatpush3.bf16.msra.mxu0 %v1755_v40 }
 0x3ca   :  { %1556 = vmatprep.subr.bf16.mxu0 %v1875_v2 }
 0x3cd   :  { %1557 = vmatpush3.bf16.msra.mxu0 %v1756_v41 }
 0x3ce   :  { %1558 = vmatprep.subr.bf16.mxu0 %v1875_v2 }
 0x3d1   :  { %1559 = vmatpush3.bf16.msra.mxu0 %v1757_v42 }
 0x3d2   :  { %1560 = vmatprep.subr.bf16.mxu0 %v1875_v2 }
 0x3d5   :  { %1561 = vmatpush3.bf16.msra.mxu0 %v1758_v43 }
 0x3d6   :  { %1562 = vmatprep.subr.bf16.mxu0 %v1875_v2 }
 0x3d9   :  { %1563 = vmatpush3.bf16.msra.mxu0 %v1759_v44 }
 0x3da   :  { %1564 = vmatprep.subr.bf16.mxu0 %v1875_v2 }
 0x3dd   :  { %1565 = vmatpush3.bf16.msra.mxu0 %v1760_v45 }
 0x3de   :  { %1566 = vmatprep.subr.bf16.mxu0 %v1875_v2 }
 0x3e1   :  { %1567 = vmatpush3.bf16.msra.mxu0 %v1761_v54 }
 0x3e2   :  { %1568 = vmatprep.subr.bf16.mxu0 %v1875_v2 }
 0x3e5   :  { %1569 = vmatpush3.bf16.msra.mxu0 %v1762_v55 }
 0x49b   :  { %v978_v47 = vpop.f32.mrb[8].mxu0 }
 0x49c   :  { %v979_v48 = vadd.f32 %v978_v47, %v894_v46  ;;  %v1532_v49 = vpop.f32.mrb[9].mxu0 }
 0x49d   :  { %v981_v50 = vpop.f32.mrb[10].mxu0 }
 0x49e   :  { %v984_v51 = vmax.f32 %v979_v48, 0.0  ;;  %v1533_v52 = vpop.f32.mrb[11].mxu0 }
 0x4a0   :  { %v1002_v53 = vpack.c.bf16 %v984_v51, %v984_v51 }
 0x4a2   :  { %1551 = vmatmul.mubr.bf16.vlgmr.msra.gmra.mrb[8].mxu1 %v1002_v53 }
 0x4a3   :  { %1590 = vmatprep.mubr.msk.bf16.mxu1 %vm1876_vm0, %v1875_v2  ;;  %1575 = vmatpush3.bf16.msra.mxu1 %v1763_v56 }
 0x4a4   :  { %1576 = vmatprep.subr.bf16.mxu1 %v1875_v2 }
 0x4a7   :  { %1577 = vmatpush3.bf16.msra.mxu1 %v1764_v57 }
 0x4a8   :  { %1578 = vmatprep.subr.bf16.mxu1 %v1875_v2 }
 0x4ab   :  { %1579 = vmatpush3.bf16.msra.mxu1 %v1765_v58 }
 0x4ac   :  { %1580 = vmatprep.subr.bf16.mxu1 %v1875_v2 }
 0x4af   :  { %1581 = vmatpush3.bf16.msra.mxu1 %v1766_v59 }
 0x4b0   :  { %1582 = vmatprep.subr.bf16.mxu1 %v1875_v2 }
 0x4b3   :  { %1583 = vmatpush3.bf16.msra.mxu1 %v1767_v60 }
 0x4b4   :  { %1584 = vmatprep.subr.bf16.mxu1 %v1875_v2 }
 0x4b7   :  { %1585 = vmatpush3.bf16.msra.mxu1 %v1768_v61 }
 0x4b8   :  { %1586 = vmatprep.subr.bf16.mxu1 %v1875_v2 }
 0x4bb   :  { %1587 = vmatpush3.bf16.msra.mxu1 %v1769_v7 }
 0x4bc   :  { %1588 = vmatprep.subr.bf16.mxu1 %v1875_v2 }
 0x4bf   :  { %1589 = vmatpush3.bf16.msra.mxu1 %v1770_v8 }
 0x575   :  { %v1085_v63 = vpop.f32.mrb[8].mxu1 }
 0x576   :  { %v1086_v0 = vadd.f32 %v1085_v63, %v1001_v62  ;;  %v1552_v1 = vpop.f32.mrb[9].mxu1 }
 0x577   :  { %v1088_v3 = vpop.f32.mrb[10].mxu1 }
 0x578   :  { %v1091_v4 = vmax.f32 %v1086_v0, 0.0  ;;  %v1553_v5 = vpop.f32.mrb[11].mxu1 }
 0x57a   :  { %v1109_v6 = vpack.c.bf16 %v1091_v4, %v1091_v4 }
 0x57c   :  { %1571 = vmatmul.mubr.bf16.vlgmr.msra.gmra.mrb[12].mxu0 %v1109_v6 }
 0x64f   :  { %v1192_v10 = vpop.f32.mrb[12].mxu0 }
 0x650   :  { %v1193_v11 = vadd.f32 %v1192_v10, %v1108_v9  ;;  %v1572_v12 = vpop.f32.mrb[13].mxu0 }
 0x651   :  { %v1195_v13 = vpop.f32.mrb[14].mxu0 }
 0x652   :  { %v1198_v14 = vmax.f32 %v1193_v11, 0.0  ;;  %v1573_v15 = vpop.f32.mrb[15].mxu0 }
 0x654   :  { %v1216_v16 = vpack.c.bf16 %v1198_v14, %v1198_v14 }
 0x656   :  { %1591 = vmatmul.mubr.bf16.vlgmr.msra.gmra.mrb[12].mxu1 %v1216_v16 }
 0x729   :  { %v1299_v20 = vpop.f32.mrb[12].mxu1 }
 0x72a   :  { %v1300_v21 = vadd.f32 %v1299_v20, %v1215_v18  ;;  %v1592_v22 = vpop.f32.mrb[13].mxu1 }
 0x72b   :  { %v1302_v23 = vpop.f32.mrb[14].mxu1 }
 0x72c   :  { %v1305_v24 = vsub.f32 0.0, %v1300_v21  ;;  %v1593_v17 = vpop.f32.mrb[15].mxu1 }
 0x72e   :  { %v1306_v19 = vmul.f32 1.442695, %v1305_v24 }
 0x730   :  { %1771 = vpow2.f32 %v1306_v19 }
 0x73a   :  { %v1772_v2 = vpop.eup %1771 }
 0x73b   :  { %v1308_v25 = vadd.f32 1.0, %v1772_v2 }
 0x73d   :  { %1773 = vrcp.f32 %v1308_v25 }
 0x747   :  { %v1774_v26 = vpop.eup %1773 }
 0x748   :  { %1311 = vst [vmem:[#allocation8] sm:$0xff] %v1774_v26 }
 0x749   :  { %1852 = shalt.err (!%p1849_p0)
}
 0x74a   :  { %s1853_s25 = scalar_lea.hbm %s1999_s3, 128 }
 0x74b   :  { %p1854_p1 = scmp.ne.s32.totalorder %s1999_s3, %s1853_s25  ;;  %p1857_p2 = scmp.lt.u32.totalorder %s1853_s25, %s1999_s3 }
 0x74d   :  { %p1859_p3 = pnand %p1857_p2, %p1854_p1 }
 0x74f   :  { %1862 = shalt.err (!%p1859_p3)
}
 0x750   :  { %1321 = dma.vmem_to_hbm [thread:$0]  %s1319_s21, 128, %s1999_s3, [#allocation4]  }
 0x751   :  { %1867 = dma.done.wait [#allocation4], 128  }
 0x752   :  { %1868 = vsyncadd [#allocation4], 4294967168 }
 0x753   :  { %1325 = vsyncpa [#allocation3], 1 }
 0x754   :  { %1326 = vsyncpa [#allocation6], 1 }
 0x755   :  { %1327 = vsyncpa [#allocation4], 1 }

</bundles_post_ra>
